<compile_context>
chip_gen: v6e
topology: v6e:2x2x1
jax: 0.10.0
libtpu: 0.0.40
codegen_flags: <defaults>
</compile_context>

<pallas_src>
import functools

import jax
import jax.numpy as jnp
from jax.experimental import pallas as pl
from jax.experimental.pallas import tpu as pltpu


def _drloss_kernel(feat_ref, target_ref, out_ref, acc_ref, *,
                   n_total, row_tile, steps_per_core):
    c = pl.program_id(0)          # partition (TensorCore) index  -- "parallel"
    i = pl.program_id(1)          # row-tile step in this partition -- reduction

    @pl.when(i == 0)
    def _():
        acc_ref[...] = jnp.zeros_like(acc_ref)

    f = feat_ref[...].astype(jnp.float32)
    t = target_ref[...].astype(jnp.float32)

    # Per-row dot product over the feature (lane) axis.
    dot = jnp.sum(f * t, axis=1, keepdims=True)            # (row_tile, 1)
    err = (dot - 1.0) ** 2                                  # h_norm2 = m_norm2 = 1

    # Mask rows outside the real batch (remainder tile / clamped extra steps).
    tile_idx = c * steps_per_core + i
    local_row = jax.lax.broadcasted_iota(jnp.int32, (row_tile, 1), 0)
    global_row = tile_idx * row_tile + local_row
    err = jnp.where(global_row < n_total, err, 0.0)

    acc_ref[...] += err                                     # pure VALU add per step

    @pl.when(i == steps_per_core - 1)
    def _():
        partial = jnp.sum(acc_ref[...])                     # one XLU reduce at the end
        out_ref[...] = jnp.broadcast_to(partial, out_ref.shape)


def dr_loss(feat, target, *, loss_weight=1.0, row_tile=None):
    """Pallas implementation of DRLoss.forward (reduction='mean'). Returns scalar f32."""
    n, d = feat.shape
    assert target.shape == (n, d)

    itemsize = max(jnp.dtype(feat.dtype).itemsize, jnp.dtype(target.dtype).itemsize)

    # Cap row tile so double-buffered inputs (2 arrays x 2 buffers) <= ~24 MiB.
    input_budget = 24 << 20
    max_rows = max(8, (input_budget // (4 * d * itemsize)) // 8 * 8)

    if row_tile is None:
        row_tile = 512                       # ~85% of HBM roofline per measured sweeps
    n_pad8 = -(-n // 8) * 8
    row_tile = max(8, (min(row_tile, max_rows, n_pad8) // 8) * 8)

    n_row_tiles = -(-n // row_tile)
    num_partitions = 2 if n_row_tiles >= 2 else 1           # v7x: one per TensorCore
    steps_per_core = -(-n_row_tiles // num_partitions)

    def in_map(c, i):
        # Clamp so fully-out-of-range steps re-read the last tile (masked to 0 in-kernel).
        return (jnp.minimum(c * steps_per_core + i, n_row_tiles - 1), 0)

    kernel = functools.partial(
        _drloss_kernel, n_total=n, row_tile=row_tile, steps_per_core=steps_per_core)

    # VMEM limit: double-buffered inputs + f32 elementwise intermediates + headroom.
    vmem_limit = 4 * row_tile * d * itemsize + 3 * row_tile * d * 4 + (2 << 20)
    vmem_limit = int(min(max(vmem_limit, 16 << 20), 60 << 20))

    partials = pl.pallas_call(
        kernel,
        out_shape=jax.ShapeDtypeStruct((num_partitions, 8, 128), jnp.float32),
        grid_spec=pltpu.PrefetchScalarGridSpec(
            num_scalar_prefetch=0,
            grid=(num_partitions, steps_per_core),
            in_specs=[
                pl.BlockSpec((row_tile, d), in_map),
                pl.BlockSpec((row_tile, d), in_map),
            ],
            out_specs=pl.BlockSpec((1, 8, 128), lambda c, i: (c, 0, 0)),
            scratch_shapes=[pltpu.VMEM((row_tile, 1), jnp.float32)],
        ),
        compiler_params=pltpu.CompilerParams(
            dimension_semantics=("parallel", "arbitrary"),
            vmem_limit_bytes=vmem_limit,
        ),
    )(feat, target)

    total = jnp.sum(partials[:, 0, 0])
    return (0.5 * (total / jnp.float32(n)) * jnp.float32(loss_weight)).astype(jnp.float32)


def _dr_loss_ref(feat, target, loss_weight=1.0):
    dot = jnp.sum(feat.astype(jnp.float32) * target.astype(jnp.float32), axis=1)
    return 0.5 * jnp.mean((dot - 1.0) ** 2) * loss_weight


if __name__ == "__main__":
    key = jax.random.PRNGKey(0)
    k1, k2 = jax.random.split(key)

    # Small shapes consistent with (batch, feature_dim).
    N, D = 16, 32
    feat = jax.random.normal(k1, (N, D), dtype=jnp.float32)
    target = jax.random.normal(k2, (N, D), dtype=jnp.float32)

    loss = jax.block_until_ready(dr_loss(feat, target, loss_weight=1.0))
    ref = _dr_loss_ref(feat, target, loss_weight=1.0)
    assert jnp.allclose(loss, ref, rtol=1e-5, atol=1e-5), (loss, ref)

    # Exercise the remainder-masking + two-partition (dual-TC) path with bf16 inputs.
    N2, D2 = 1000, 96
    f2 = jax.random.normal(k1, (N2, D2), dtype=jnp.bfloat16)
    t2 = jax.random.normal(k2, (N2, D2), dtype=jnp.bfloat16)
    loss2 = jax.block_until_ready(dr_loss(f2, t2, loss_weight=0.5, row_tile=128))
    ref2 = _dr_loss_ref(f2, t2, loss_weight=0.5)
    assert jnp.allclose(loss2, ref2, rtol=2e-2, atol=2e-2), (loss2, ref2)

    print("KERNEL_OK")
</pallas_src>

<mosaic_0001>
module attributes {stable_mosaic.version = 11 : i64} {
  func.func @_drloss_kernel(%arg0: i32, %arg1: i32, %arg2: memref<16x32xf32, #tpu.memory_space<vmem>>, %arg3: memref<16x32xf32, #tpu.memory_space<vmem>>, %arg4: memref<1x8x128xf32, #tpu.memory_space<vmem>>, %arg5: memref<16x1xf32, #tpu.memory_space<vmem>>) attributes {dimension_semantics = [#tpu.dimension_semantics<parallel>, #tpu.dimension_semantics<arbitrary>], iteration_bounds = array<i64: 1, 1>, scalar_prefetch = 0 : i64, scratch_operands = 1 : i64, tpu.core_type = #tpu.core_type<tc>, window_params = [{transform_indices = @transform_0, window_bounds = array<i64: 16, 32>}, {transform_indices = @transform_1, window_bounds = array<i64: 16, 32>}, {transform_indices = @transform_2, window_bounds = array<i64: 1, 8, 128>}]} {
    %c0_i32 = arith.constant 0 : i32
    %0 = arith.cmpi eq, %arg1, %c0_i32 : i32
    %1 = arith.extui %0 : i1 to i32
    %c0_i32_0 = arith.constant 0 : i32
    %2 = arith.cmpi ne, %1, %c0_i32_0 : i32
    scf.if %2 {
      %cst_13 = arith.constant 0.000000e+00 : f32
      %27 = vector.broadcast %cst_13 : f32 to vector<16x1xf32>
      %c0_14 = arith.constant 0 : index
      %c0_15 = arith.constant 0 : index
      %28 = vector.load %arg5[%c0_14, %c0_15] : memref<16x1xf32, #tpu.memory_space<vmem>>, vector<16x1xf32>
      tpu.vector_store %arg5[%c0_14, %c0_15], %27 {strides = array<i32>} : memref<16x1xf32, #tpu.memory_space<vmem>>, vector<16x1xf32>,
    } else {
    }
    %c0 = arith.constant 0 : index
    %c0_1 = arith.constant 0 : index
    %3 = vector.load %arg2[%c0, %c0_1] : memref<16x32xf32, #tpu.memory_space<vmem>>, vector<16x32xf32>
    %c0_2 = arith.constant 0 : index
    %c0_3 = arith.constant 0 : index
    %4 = vector.load %arg3[%c0_2, %c0_3] : memref<16x32xf32, #tpu.memory_space<vmem>>, vector<16x32xf32>
    %5 = arith.mulf %3, %4 : vector<16x32xf32>
    %cst = arith.constant dense<0.000000e+00> : vector<16xf32>
    %6 = vector.multi_reduction <add>, %5, %cst [1] : vector<16x32xf32> to vector<16xf32>
    %7 = vector.shape_cast %6 : vector<16xf32> to vector<16x1xf32>
    %cst_4 = arith.constant 1.000000e+00 : f32
    %8 = vector.broadcast %cst_4 : f32 to vector<16x1xf32>
    %9 = arith.subf %7, %8 : vector<16x1xf32>
    %10 = arith.mulf %9, %9 : vector<16x1xf32>
    %c1_i32 = arith.constant 1 : i32
    %11 = arith.muli %arg0, %c1_i32 : i32
    %12 = arith.addi %11, %arg1 : i32
    %13 = tpu.iota {dimensions = array<i32: 0>} : vector<16x1xi32>
    %c16_i32 = arith.constant 16 : i32
    %14 = arith.muli %12, %c16_i32 : i32
    %15 = vector.broadcast %14 : i32 to vector<16x1xi32>
    %16 = arith.addi %15, %13 : vector<16x1xi32>
    %c16_i32_5 = arith.constant 16 : i32
    %17 = vector.broadcast %c16_i32_5 : i32 to vector<16x1xi32>
    %18 = arith.cmpi slt, %16, %17 : vector<16x1xi32>
    %cst_6 = arith.constant 0.000000e+00 : f32
    %19 = vector.broadcast %cst_6 : f32 to vector<16x1xf32>
    %20 = arith.select %18, %10, %19 : vector<16x1xi1>, vector<16x1xf32>
    %c0_7 = arith.constant 0 : index
    %c0_8 = arith.constant 0 : index
    %21 = vector.load %arg5[%c0_7, %c0_8] : memref<16x1xf32, #tpu.memory_space<vmem>>, vector<16x1xf32>
    %22 = arith.addf %21, %20 : vector<16x1xf32>
    %c0_9 = arith.constant 0 : index
    %c0_10 = arith.constant 0 : index
    %23 = vector.load %arg5[%c0_9, %c0_10] : memref<16x1xf32, #tpu.memory_space<vmem>>, vector<16x1xf32>
    tpu.vector_store %arg5[%c0_9, %c0_10], %22 {strides = array<i32>} : memref<16x1xf32, #tpu.memory_space<vmem>>, vector<16x1xf32>,
    %c0_i32_11 = arith.constant 0 : i32
    %24 = arith.cmpi eq, %arg1, %c0_i32_11 : i32
    %25 = arith.extui %24 : i1 to i32
    %c0_i32_12 = arith.constant 0 : i32
    %26 = arith.cmpi ne, %25, %c0_i32_12 : i32
    scf.if %26 {
      %c0_13 = arith.constant 0 : index
      %c0_14 = arith.constant 0 : index
      %27 = vector.load %arg5[%c0_13, %c0_14] : memref<16x1xf32, #tpu.memory_space<vmem>>, vector<16x1xf32>
      %28 = vector.shape_cast %27 : vector<16x1xf32> to vector<1x16x1xf32>
      %cst_15 = arith.constant dense<0.000000e+00> : vector<1xf32>
      %29 = vector.multi_reduction <add>, %28, %cst_15 [1, 2] : vector<1x16x1xf32> to vector<1xf32>
      %30 = vector.shape_cast %29 : vector<1xf32> to vector<1x1x1xf32>
      %31 = vector.extract %30[0, 0, 0] : f32 from vector<1x1x1xf32>
      %32 = vector.broadcast %31 : f32 to vector<1x8x128xf32>
      %c0_16 = arith.constant 0 : index
      %c0_17 = arith.constant 0 : index
      %c0_18 = arith.constant 0 : index
      %33 = vector.load %arg4[%c0_16, %c0_17, %c0_18] : memref<1x8x128xf32, #tpu.memory_space<vmem>>, vector<1x8x128xf32>
      tpu.vector_store %arg4[%c0_16, %c0_17, %c0_18], %32 {strides = array<i32>} : memref<1x8x128xf32, #tpu.memory_space<vmem>>, vector<1x8x128xf32>,
    } else {
    }
    return
  }
  func.func @transform_0(%arg0: i32, %arg1: i32) -> (i32, i32) {
    %c1_i32 = arith.constant 1 : i32
    %0 = arith.muli %arg0, %c1_i32 : i32
    %1 = arith.addi %0, %arg1 : i32
    %c0_i32 = arith.constant 0 : i32
    %2 = arith.minsi %1, %c0_i32 : i32
    %c0_i32_0 = arith.constant 0 : i32
    %c0_i32_1 = arith.constant 0 : i32
    return %2, %c0_i32_0 : i32, i32
  }
  func.func @transform_1(%arg0: i32, %arg1: i32) -> (i32, i32) {
    %c1_i32 = arith.constant 1 : i32
    %0 = arith.muli %arg0, %c1_i32 : i32
    %1 = arith.addi %0, %arg1 : i32
    %c0_i32 = arith.constant 0 : i32
    %2 = arith.minsi %1, %c0_i32 : i32
    %c0_i32_0 = arith.constant 0 : i32
    %c0_i32_1 = arith.constant 0 : i32
    return %2, %c0_i32_0 : i32, i32
  }
  func.func @transform_2(%arg0: i32, %arg1: i32) -> (i32, i32, i32) {
    %c0_i32 = arith.constant 0 : i32
    %c0_i32_0 = arith.constant 0 : i32
    %c0_i32_1 = arith.constant 0 : i32
    return %arg0, %c0_i32, %c0_i32_0 : i32, i32, i32
  }
}

</mosaic_0001>

<bundles_post_ra>
// kernel: tpu_custom_call.1
= control target key start
LH: loop header
LB: loop body
LE: loop exit
PB: predicated region body
PF: predicated region fallthrough
CT: control target
= control target key end

     0   :  { %7 = vsyncpa [#allocation4], 0  ;;  %s254_s0 = inlined_call_operand.hbm [shape: f32[16,32], index: 0, kind: input, shape index: {}]   ;;  %s255_s1 = inlined_call_operand.hbm [shape: f32[16,32], index: 1, kind: input, shape index: {}]   ;;  %s256_s2 = inlined_call_operand.hbm [shape: f32[1,8,128], index: 2, kind: output, shape index: {}]  }
   0x1   :  { %8 = vsyncpa [#allocation7], 0 }
   0x2   :  { %9 = vsyncpa [#allocation5], 0  ;;  %s218_s9 = smov [#allocation3]  }
   0x3   :  { %s21_s10 = sshll.u32 %s218_s9, 4  ;;  %s22_s10 = int_to_ptr.vmem [resolvable:$true] %s21_s10 }
   0x4   :  { %s160_s11 = scalar_lea.vmem %s22_s10, 256  ;;  %p165_p1 = scmp.lt.s32.totalorder %s22_s10, %s22_s10 }
   0x5   :  { %p161_p0 = scmp.ne.s32.totalorder %s22_s10, %s160_s11  ;;  %p166_p2 = scmp.lt.s32.totalorder %s160_s11, %s160_s11 }
   0x7   :  { %p167_p3 = por %p166_p2, %p165_p1 }
   0x9   :  { %p168_p4 = pnand %p167_p3, %p161_p0 }
   0xb   :  { %171 = shalt.err (!%p168_p4)
}
   0xc   :  { %s219_s12 = smov 128   ;;  %s220_s13 = smov 8  }
   0xd   :  { %27 = dma.hbm_to_vmem [thread:$0]  %s254_s0, 256, %s22_s10, [#allocation4], %s219_s12, %s219_s12, %s220_s13  }
   0xe   :  { %s221_s16 = smov [#allocation6]  }
   0xf   :  { %s39_s17 = sshll.u32 %s221_s16, 4  ;;  %s40_s17 = int_to_ptr.vmem [resolvable:$true] %s39_s17 }
  0x10   :  { %s180_s18 = scalar_lea.vmem %s40_s17, 256  ;;  %p185_p6 = scmp.lt.s32.totalorder %s40_s17, %s40_s17 }
  0x11   :  { %p181_p5 = scmp.ne.s32.totalorder %s40_s17, %s180_s18  ;;  %p186_p7 = scmp.lt.s32.totalorder %s180_s18, %s180_s18 }
  0x13   :  { %p187_p8 = por %p186_p7, %p185_p6 }
  0x15   :  { %p188_p9 = pnand %p187_p8, %p181_p5 }
  0x17   :  { %191 = shalt.err (!%p188_p9)
}
  0x18   :  { %45 = dma.hbm_to_vmem [thread:$0]  %s255_s1, 256, %s40_s17, [#allocation7], %s219_s12, %s219_s12, %s220_s13  }
  0x19   :  { %212 = dma.done.wait [#allocation4], 256  }
  0x1a   :  { %213 = vsyncadd [#allocation4], 4294967040 }
  0x1b   :  { %214 = dma.done.wait [#allocation7], 256  }
  0x1c   :  { %215 = vsyncadd [#allocation7], 4294967040  ;;  %vm64_vm0 = vcmask 7168   ;;  %v222_v0 = vmov 0.0   ;;  %v67_v1 = vld [vmem:[#allocation3] sm:$0xff]  ;;  %v69_v2 = vld [vmem:[#allocation6] sm:$0xff] }
  0x1d   :  { %65 = vst.msk [vmem:[#allocation2] sm:$0xff] %vm64_vm0, %v222_v0  ;;  %66 = vst.msk [vmem:[#allocation2 + $0x8] sm:$0xff] %vm64_vm0, %v222_v0  ;;  %vm73_vm1 = vcmask 261120   ;;  %v68_v3 = vld [vmem:[#allocation3 + $0x8] sm:$0xff]  ;;  %v71_v4 = vmul.f32 %v69_v2, %v67_v1  ;;  %v70_v5 = vld [vmem:[#allocation6 + $0x8] sm:$0xff]  ;;  %s223_s0 = smov [#allocation8]  }
  0x1e   :  { %v72_v6 = vmul.f32 %v70_v5, %v68_v3  ;;  %s128_s1 = sshll.u32 %s223_s0, 4  ;;  %s129_s1 = int_to_ptr.vmem [resolvable:$true] %s128_s1 }
  0x1f   :  { %v74_v7 = vsel %vm73_vm1, %v71_v4, 0.0  ;;  %s192_s22 = scalar_lea.vmem %s129_s1, 128  ;;  %p197_p11 = scmp.lt.s32.totalorder %s129_s1, %s129_s1 }
  0x20   :  { %75 = vadd.xlane.f32.xlu0 %v74_v7  ;;  %v77_v8 = vsel %vm73_vm1, %v72_v6, 0.0  ;;  %p193_p10 = scmp.ne.s32.totalorder %s129_s1, %s192_s22  ;;  %p198_p12 = scmp.lt.s32.totalorder %s192_s22, %s192_s22 }
  0x22   :  { %p199_p13 = por %p198_p12, %p197_p11 }
  0x24   :  { %78 = vadd.xlane.f32.xlu0 %v77_v8  ;;  %v96_v11 = vld [vmem:[#allocation2] sm:$0xff]  ;;  %v97_v16 = vld [vmem:[#allocation2 + $0x8] sm:$0xff]  ;;  %p200_p0 = pnand %p199_p13, %p193_p10 }
  0xa9   :  { %v76_v9 = vpop.xlane.xlu0 %75 }
  0xaa   :  { %v142_v10 = vadd.f32 -1.0, %v76_v9 }
  0xac   :  { %v82_v12 = vmul.f32 %v142_v10, %v142_v10 }
  0xad   :  { %v79_v13 = vpop.xlane.xlu0 %78 }
  0xae   :  { %v98_v14 = vadd.f32 %v96_v11, %v82_v12  ;;  %v143_v15 = vadd.f32 -1.0, %v79_v13 }
  0xb0   :  { %101 = vst.msk [vmem:[#allocation2] sm:$0xff] %vm64_vm0, %v98_v14  ;;  %v83_v17 = vmul.f32 %v143_v15, %v143_v15 }
  0xb2   :  { %v99_v18 = vadd.f32 %v97_v16, %v83_v17 }
  0xb4   :  { %102 = vst.msk [vmem:[#allocation2 + $0x8] sm:$0xff] %vm64_vm0, %v99_v18 }
  0xb7   :  { %v106_v19 = vld [vmem:[#allocation2] sm:$0xff] }
  0xb8   :  { %v108_v21 = vsel %vm64_vm0, %v106_v19, 0.0 }
  0xbb   :  { %v107_v20 = vld [vmem:[#allocation2 + $0x8] sm:$0xff] }
  0xbc   :  { %v109_v22 = vsel %vm64_vm0, %v107_v20, 0.0 }
  0xbd   :  { %v110_v23 = vadd.f32 %v109_v22, %v108_v21 }
  0xbf   :  { %111 = vadd.xlane.f32.xlu1 %v110_v23 }
 0x148   :  { %v112_v24 = vpop.xlane.xlu1 %111 }
 0x149   :  { %v113_v25 = vrot.slane %v112_v24, 4 }
 0x14b   :  { %v114_v26 = vadd.f32 %v113_v25, %v112_v24 }
 0x14d   :  { %v115_v27 = vrot.slane %v114_v26, 2 }
 0x14f   :  { %v116_v28 = vadd.f32 %v115_v27, %v114_v26 }
 0x151   :  { %v117_v29 = vrot.slane %v116_v28, 1 }
 0x153   :  { %v118_v30 = vadd.f32 %v117_v29, %v116_v28 }
 0x155   :  { %144 = vpush %v118_v30 }
 0x186   :  { %s145_s21 = spop %144 }
 0x187   :  { %v120_v31 = vstv %s145_s21 }
 0x188   :  { %121 = vst [vmem:[#allocation8] sm:$0xff] %v120_v31 }
 0x189   :  { %203 = shalt.err (!%p200_p0)
}
 0x18a   :  { %131 = dma.vmem_to_hbm [thread:$0]  %s129_s1, 128, %s256_s2, [#allocation5]  }
 0x18b   :  { %216 = dma.done.wait [#allocation5], 128  }
 0x18c   :  { %217 = vsyncadd [#allocation5], 4294967168 }
 0x18d   :  { %135 = vsyncpa [#allocation4], 1 }
 0x18e   :  { %136 = vsyncpa [#allocation7], 1 }
 0x18f   :  { %137 = vsyncpa [#allocation5], 1 }

</bundles_post_ra>
